<compile_context>
chip_gen: v6e
topology: v6e:2x2x1
jax: 0.10.0
libtpu: 0.0.40
codegen_flags: <defaults>
</compile_context>

<pallas_src>
import jax
import jax.numpy as jnp
from jax.experimental import pallas as pl
from jax.experimental.pallas import tpu as pltpu


ZD = 16
XD = 256


def vae_kernel(x_ref, eps_ref, w_enc_ref, b_enc_ref, w_dec_ref, b_dec_ref,
               out_ref, mulogvar_ref):
    f32 = jnp.float32

    # Cast x to bf16 in-kernel (VPU cast hidden under the DMA) so the encoder
    # matmul is a single bf16 MXU pass with f32 accumulation.
    # TODO(synk): nn.Dropout(0.2) training-mode masking not implemented
    # (eval/identity here; the affine fusion is only valid in eval mode).
    x_bf = x_ref[...].astype(jnp.bfloat16)
    h = jnp.dot(x_bf, w_enc_ref[...],
                preferred_element_type=f32) + b_enc_ref[...]

    # Single lane-contiguous (tile_b, 2*ZD) f32 store; mu/logvar split in wrapper.
    mulogvar_ref[...] = h

    mu = h[:, :ZD]
    logvar = h[:, ZD:]

    # Reparameterization: z = eps * exp(0.5 * logvar) + mu  (EUP exp + VPU fma)
    z = eps_ref[...] * jnp.exp(0.5 * logvar) + mu

    # Fused decoder: one MXU push + bias + final tanh; store at out dtype
    # (bf16 by default -> halves the dominant HBM write stream).
    d = jnp.dot(z.astype(jnp.bfloat16), w_dec_ref[...],
                preferred_element_type=f32) + b_dec_ref[...]
    out_ref[...] = jnp.tanh(d).astype(out_ref.dtype)


# ----------------------------- parameters -----------------------------------

def init_params(key, zd=ZD, xd=XD):
    """Deterministic PyTorch-nn.Linear-style uniform init.

    Weights are stored as (in_features, out_features), i.e. already transposed
    relative to torch (so h @ W + b  ==  torch's  h @ W_torch.T + b)."""
    enc_dims = [(xd, zd * 8), (zd * 8, 4 * zd), (4 * zd, zd * 4), (zd * 4, zd * 2)]
    dec_dims = [(zd, 16 * zd), (16 * zd, 16 * zd), (16 * zd, 16 * zd),
                (16 * zd, 16 * zd), (16 * zd, xd)]
    params = []
    for fan_in, fan_out in enc_dims + dec_dims:
        key, kw, kb = jax.random.split(key, 3)
        bound = 1.0 / (fan_in ** 0.5)
        w = jax.random.uniform(kw, (fan_in, fan_out), jnp.float32, -bound, bound)
        b = jax.random.uniform(kb, (1, fan_out), jnp.float32, -bound, bound)
        params.append((w, b))
    return params  # list of (w, b): 4 encoder layers then 5 decoder layers


def _fuse_chain(layers):
    w, b = layers[0]
    for wi, bi in layers[1:]:
        w = w @ wi
        b = b @ wi + bi
    return w, b


def fuse_params(params):
    """One-time folding of the activation-free Linear chains into two affines.

    Returns bf16 matmul weights and f32 biases for the kernel.
    Note: bf16 W_enc quantizes mu/logvar by ~0.4% relative error; keep the
    encoder weights f32 if tighter accuracy on logvar is required."""
    enc, dec = params[:4], params[4:]
    w_enc, b_enc = _fuse_chain(enc)   # (XD, 2*ZD), (1, 2*ZD)
    w_dec, b_dec = _fuse_chain(dec)   # (ZD, XD),   (1, XD)
    return (w_enc.astype(jnp.bfloat16), b_enc,
            w_dec.astype(jnp.bfloat16), b_dec)


# ----------------------------- tiling / wrapper ------------------------------

def _round_up(n, m):
    return ((n + m - 1) // m) * m


def _choose_tiling(B, requested=None, tile_cap=2048, min_steps=4):
    """Pick (tile_b, padded_B).

    * tile_cap=2048 keeps the double-buffered per-step working set (~7 MB)
      safely under the v7x 64 MiB VMEM / 32 MiB scoped default (and trivially
      under v5e/v6e), while large enough to amortize the ~0.35 us/step cost.
    * min_steps=4 keeps >=2 grid steps per TensorCore on v7x (2-TC chips) and
      gives the pipeliner something to overlap.
    """
    if requested is not None:
        tile = _round_up(min(requested, _round_up(B, 8)), 8)
    else:
        nsteps = max(min_steps, pl.cdiv(B, tile_cap))
        tile = _round_up(pl.cdiv(B, nsteps), 8)
        tile = min(tile, _round_up(B, 8))
    nsteps = pl.cdiv(B, tile)
    return tile, nsteps * tile


def vae_forward(x, eps, fused_params, *, tile_b=None, out_dtype=jnp.bfloat16):
    """Runs the fused VAE forward. Returns (decoded_out, mu, logvar)."""
    w_enc, b_enc, w_dec, b_dec = fused_params
    B = x.shape[0]

    tile_b, Bp = _choose_tiling(B, tile_b)
    if Bp != B:
        # TODO(synk): for bandwidth-critical ragged batches, replace this pad
        # (full HBM copy of x/eps) with a masked tail tile; the auto-tiler
        # keeps the pad to <8*grid rows so it is a corner case here.
        x = jnp.pad(x, ((0, Bp - B), (0, 0)))
        eps = jnp.pad(eps, ((0, Bp - B), (0, 0)))

    grid = (Bp // tile_b,)

    out, mulogvar = pl.pallas_call(
        vae_kernel,
        out_shape=(
            jax.ShapeDtypeStruct((Bp, XD), out_dtype),         # decoded output
            jax.ShapeDtypeStruct((Bp, 2 * ZD), jnp.float32),   # mu || logvar
        ),
        grid=grid,
        in_specs=[
            pl.BlockSpec((tile_b, XD), lambda i: (i, 0)),      # x tile (f32)
            pl.BlockSpec((tile_b, ZD), lambda i: (i, 0)),      # eps tile
            pl.BlockSpec((XD, 2 * ZD), lambda i: (0, 0)),      # fused enc W (resident)
            pl.BlockSpec((1, 2 * ZD), lambda i: (0, 0)),       # fused enc b (resident)
            pl.BlockSpec((ZD, XD), lambda i: (0, 0)),          # fused dec W (resident)
            pl.BlockSpec((1, XD), lambda i: (0, 0)),           # fused dec b (resident)
        ],
        out_specs=(
            pl.BlockSpec((tile_b, XD), lambda i: (i, 0)),
            pl.BlockSpec((tile_b, 2 * ZD), lambda i: (i, 0)),
        ),
        compiler_params=pltpu.CompilerParams(
            dimension_semantics=("parallel",),   # batch axis -> megacore sharding
        ),
    )(x, eps, w_enc, b_enc, w_dec, b_dec)

    if Bp != B:
        out = out[:B]
        mulogvar = mulogvar[:B]
    return out, mulogvar[:, :ZD], mulogvar[:, ZD:]


# ------------------------- pure-JAX references ------------------------------

def vae_forward_ref_fused(x, eps, fused_params, out_dtype=jnp.bfloat16):
    """Exactly the fused bf16-in / f32-accumulate math the kernel performs."""
    w_enc, b_enc, w_dec, b_dec = fused_params
    h = jnp.dot(x.astype(jnp.bfloat16), w_enc,
                preferred_element_type=jnp.float32) + b_enc
    mu, logvar = h[:, :ZD], h[:, ZD:]
    z = eps * jnp.exp(0.5 * logvar) + mu
    d = jnp.dot(z.astype(jnp.bfloat16), w_dec,
                preferred_element_type=jnp.float32) + b_dec
    return jnp.tanh(d).astype(out_dtype), mu, logvar


def vae_forward_ref_layers(x, eps, params):
    """Unfused f32 layer-by-layer reference (== PyTorch module in eval mode)."""
    enc, dec = params[:4], params[4:]
    h = x
    for w, b in enc:
        h = h @ w + b
    mu, logvar = h[:, :ZD], h[:, ZD:]
    z = eps * jnp.exp(0.5 * logvar) + mu
    d = z
    for w, b in dec:
        d = d @ w + b
    return jnp.tanh(d), mu, logvar


if __name__ == "__main__":
    key = jax.random.PRNGKey(0)
    k_params, k_x, k_eps = jax.random.split(key, 3)

    B = 256  # auto-tiler -> 4 grid steps of 64 rows: exercises the batch grid
    params = init_params(k_params)
    fused = fuse_params(params)

    x = jax.random.normal(k_x, (B, XD), jnp.float32)
    eps = jax.random.normal(k_eps, (B, ZD), jnp.float32)

    out, mu, logvar = jax.block_until_ready(vae_forward(x, eps, fused))
    assert out.shape == (B, XD) and mu.shape == (B, ZD) and logvar.shape == (B, ZD)

    # exact-math check (same fused bf16 matmuls, f32 accumulation, bf16 output)
    f_out, f_mu, f_logvar = vae_forward_ref_fused(x, eps, fused)
    assert jnp.allclose(out.astype(jnp.float32), f_out.astype(jnp.float32),
                        atol=8e-3, rtol=1e-3)
    assert jnp.allclose(mu, f_mu, atol=1e-4, rtol=1e-4)
    assert jnp.allclose(logvar, f_logvar, atol=1e-4, rtol=1e-4)

    # semantic check against the original unfused f32 layer-by-layer math
    r_out, r_mu, r_logvar = vae_forward_ref_layers(x, eps, params)
    assert jnp.allclose(out.astype(jnp.float32), r_out, atol=3e-2)
    assert jnp.allclose(mu, r_mu, atol=2e-2)
    assert jnp.allclose(logvar, r_logvar, atol=2e-2)

    print("KERNEL_OK")
</pallas_src>

<mosaic_0001>
module attributes {stable_mosaic.version = 11 : i64} {
  func.func @vae_kernel(%arg0: i32, %arg1: memref<64x256xf32, #tpu.memory_space<vmem>>, %arg2: memref<64x16xf32, #tpu.memory_space<vmem>>, %arg3: memref<256x32xbf16, #tpu.memory_space<vmem>>, %arg4: memref<1x32xf32, #tpu.memory_space<vmem>>, %arg5: memref<16x256xbf16, #tpu.memory_space<vmem>>, %arg6: memref<1x256xf32, #tpu.memory_space<vmem>>, %arg7: memref<64x256xbf16, #tpu.memory_space<vmem>>, %arg8: memref<64x32xf32, #tpu.memory_space<vmem>>) attributes {dimension_semantics = [#tpu.dimension_semantics<parallel>], iteration_bounds = array<i64: 4>, scalar_prefetch = 0 : i64, scratch_operands = 0 : i64, tpu.core_type = #tpu.core_type<tc>, window_params = [{transform_indices = @transform_0, window_bounds = array<i64: 64, 256>}, {transform_indices = @transform_1, window_bounds = array<i64: 64, 16>}, {pipeline_mode = #tpu.pipeline_mode<synchronous>, transform_indices = @transform_2, window_bounds = array<i64: 256, 32>}, {pipeline_mode = #tpu.pipeline_mode<synchronous>, transform_indices = @transform_3, window_bounds = array<i64: 1, 32>}, {pipeline_mode = #tpu.pipeline_mode<synchronous>, transform_indices = @transform_4, window_bounds = array<i64: 16, 256>}, {pipeline_mode = #tpu.pipeline_mode<synchronous>, transform_indices = @transform_5, window_bounds = array<i64: 1, 256>}, {transform_indices = @transform_6, window_bounds = array<i64: 64, 256>}, {transform_indices = @transform_7, window_bounds = array<i64: 64, 32>}]} {
    %c0 = arith.constant 0 : index
    %c0_0 = arith.constant 0 : index
    %0 = vector.load %arg1[%c0, %c0_0] : memref<64x256xf32, #tpu.memory_space<vmem>>, vector<64x256xf32>
    %1 = arith.truncf %0 : vector<64x256xf32> to vector<64x256xbf16>
    %c0_1 = arith.constant 0 : index
    %c0_2 = arith.constant 0 : index
    %2 = vector.load %arg3[%c0_1, %c0_2] : memref<256x32xbf16, #tpu.memory_space<vmem>>, vector<256x32xbf16>
    %cst = arith.constant dense<0.000000e+00> : vector<64x32xf32>
    %3 = tpu.matmul %1, %2, %cst {dimension_numbers = #tpu.dot_dimension_numbers<[1], [0], [0], [1], [0, 0, 1, 1], [], []>} : vector<64x256xbf16>, vector<256x32xbf16>, vector<64x32xf32> -> vector<64x32xf32>
    %c0_3 = arith.constant 0 : index
    %c0_4 = arith.constant 0 : index
    %4 = vector.load %arg4[%c0_3, %c0_4] : memref<1x32xf32, #tpu.memory_space<vmem>>, vector<1x32xf32>
    %5 = vector.broadcast %4 : vector<1x32xf32> to vector<64x32xf32>
    %6 = arith.addf %3, %5 : vector<64x32xf32>
    %c0_5 = arith.constant 0 : index
    %c0_6 = arith.constant 0 : index
    %7 = vector.load %arg8[%c0_5, %c0_6] : memref<64x32xf32, #tpu.memory_space<vmem>>, vector<64x32xf32>
    tpu.vector_store %arg8[%c0_5, %c0_6], %6 {strides = array<i32>} : memref<64x32xf32, #tpu.memory_space<vmem>>, vector<64x32xf32>,
    %8 = vector.extract_strided_slice %6 {offsets = [0, 0], sizes = [64, 16], strides = [1, 1]} : vector<64x32xf32> to vector<64x16xf32>
    %9 = vector.extract_strided_slice %6 {offsets = [0, 16], sizes = [64, 16], strides = [1, 1]} : vector<64x32xf32> to vector<64x16xf32>
    %c0_7 = arith.constant 0 : index
    %c0_8 = arith.constant 0 : index
    %10 = vector.load %arg2[%c0_7, %c0_8] : memref<64x16xf32, #tpu.memory_space<vmem>>, vector<64x16xf32>
    %cst_9 = arith.constant 5.000000e-01 : f32
    %11 = vector.broadcast %cst_9 : f32 to vector<64x16xf32>
    %12 = arith.mulf %11, %9 : vector<64x16xf32>
    %13 = math.exp %12 : vector<64x16xf32>
    %14 = arith.mulf %10, %13 : vector<64x16xf32>
    %15 = arith.addf %14, %8 : vector<64x16xf32>
    %16 = arith.truncf %15 : vector<64x16xf32> to vector<64x16xbf16>
    %c0_10 = arith.constant 0 : index
    %c0_11 = arith.constant 0 : index
    %17 = vector.load %arg5[%c0_10, %c0_11] : memref<16x256xbf16, #tpu.memory_space<vmem>>, vector<16x256xbf16>
    %cst_12 = arith.constant dense<0.000000e+00> : vector<64x256xf32>
    %18 = tpu.matmul %16, %17, %cst_12 {dimension_numbers = #tpu.dot_dimension_numbers<[1], [0], [0], [1], [0, 0, 1, 1], [], []>} : vector<64x16xbf16>, vector<16x256xbf16>, vector<64x256xf32> -> vector<64x256xf32>
    %c0_13 = arith.constant 0 : index
    %c0_14 = arith.constant 0 : index
    %19 = vector.load %arg6[%c0_13, %c0_14] : memref<1x256xf32, #tpu.memory_space<vmem>>, vector<1x256xf32>
    %20 = vector.broadcast %19 : vector<1x256xf32> to vector<64x256xf32>
    %21 = arith.addf %18, %20 : vector<64x256xf32>
    %22 = math.tanh %21 : vector<64x256xf32>
    %23 = arith.truncf %22 : vector<64x256xf32> to vector<64x256xbf16>
    %c0_15 = arith.constant 0 : index
    %c0_16 = arith.constant 0 : index
    %24 = vector.load %arg7[%c0_15, %c0_16] : memref<64x256xbf16, #tpu.memory_space<vmem>>, vector<64x256xbf16>
    tpu.vector_store %arg7[%c0_15, %c0_16], %23 {strides = array<i32>} : memref<64x256xbf16, #tpu.memory_space<vmem>>, vector<64x256xbf16>,
    return
  }
  func.func @transform_0(%arg0: i32) -> (i32, i32) {
    %c0_i32 = arith.constant 0 : i32
    %c0_i32_0 = arith.constant 0 : i32
    return %arg0, %c0_i32 : i32, i32
  }
  func.func @transform_1(%arg0: i32) -> (i32, i32) {
    %c0_i32 = arith.constant 0 : i32
    %c0_i32_0 = arith.constant 0 : i32
    return %arg0, %c0_i32 : i32, i32
  }
  func.func @transform_2(%arg0: i32) -> (i32, i32) {
    %c0_i32 = arith.constant 0 : i32
    %c0_i32_0 = arith.constant 0 : i32
    %c0_i32_1 = arith.constant 0 : i32
    return %c0_i32, %c0_i32_0 : i32, i32
  }
  func.func @transform_3(%arg0: i32) -> (i32, i32) {
    %c0_i32 = arith.constant 0 : i32
    %c0_i32_0 = arith.constant 0 : i32
    %c0_i32_1 = arith.constant 0 : i32
    return %c0_i32, %c0_i32_0 : i32, i32
  }
  func.func @transform_4(%arg0: i32) -> (i32, i32) {
    %c0_i32 = arith.constant 0 : i32
    %c0_i32_0 = arith.constant 0 : i32
    %c0_i32_1 = arith.constant 0 : i32
    return %c0_i32, %c0_i32_0 : i32, i32
  }
  func.func @transform_5(%arg0: i32) -> (i32, i32) {
    %c0_i32 = arith.constant 0 : i32
    %c0_i32_0 = arith.constant 0 : i32
    %c0_i32_1 = arith.constant 0 : i32
    return %c0_i32, %c0_i32_0 : i32, i32
  }
  func.func @transform_6(%arg0: i32) -> (i32, i32) {
    %c0_i32 = arith.constant 0 : i32
    %c0_i32_0 = arith.constant 0 : i32
    return %arg0, %c0_i32 : i32, i32
  }
  func.func @transform_7(%arg0: i32) -> (i32, i32) {
    %c0_i32 = arith.constant 0 : i32
    %c0_i32_0 = arith.constant 0 : i32
    return %arg0, %c0_i32 : i32, i32
  }
}

</mosaic_0001>

<bundles_post_ra>
// kernel: tpu_custom_call.1
= control target key start
LH: loop header
LB: loop body
LE: loop exit
PB: predicated region body
PF: predicated region fallthrough
CT: control target
= control target key end

     0   :  { %13 = vsyncpa [#allocation3], 0  ;;  %s1689_s0 = inlined_call_operand.hbm [shape: f32[256,256], index: 0, kind: input, shape index: {}]   ;;  %s1690_s1 = inlined_call_operand.vmem [shape: f32[256,16], index: 1, kind: input, shape index: {}]   ;;  %s1691_s2 = inlined_call_operand.vmem [shape: bf16[256,32], index: 2, kind: input, shape index: {}]   ;;  %s1692_s3 = inlined_call_operand.vmem [shape: f32[1,32], index: 3, kind: input, shape index: {}]   ;;  %s1693_s4 = inlined_call_operand.vmem [shape: bf16[16,256], index: 4, kind: input, shape index: {}]   ;;  %s1694_s5 = inlined_call_operand.vmem [shape: f32[1,256], index: 5, kind: input, shape index: {}]   ;;  %s1695_s6 = inlined_call_operand.hbm [shape: bf16[256,256], index: 6, kind: output, shape index: {0}]   ;;  %s1696_s7 = inlined_call_operand.vmem [shape: f32[256,32], index: 7, kind: output, shape index: {1}]  }
   0x1   :  { %15 = vsyncpa [#allocation3 + $0x1], 0 }
   0x2   :  { %16 = vsyncpa [#allocation4], 0 }
   0x3   :  { %18 = vsyncpa [#allocation4 + $0x1], 0  ;;  %s1334_s24 = smov 0   ;;  %s1336_s25 = smov 0  }
   0x4   :  { %s1338_s26 = smov 0   ;;  %s1340_s27 = smov 0  }
   0x5 LB: > { %s1355_s28 = sadd.s32 4294967295, %s1284_s27   ;;  %s970_s29 = sadd.s32 4294967294, %s1284_s27   ;;  %s1284_s27 = sphi %s1340_s27, %s1710_s27   ;;  %s1280_s26 = sphi %s1338_s26, %s1709_s26   ;;  %s1276_s25 = sphi %s1336_s25, %s1708_s25   ;;  %s1272_s24 = sphi %s1334_s24, %s1707_s24  }
   0x6   : > { %s1359_s30 = sadd.s32 1, %s1284_s27   ;;  %s31_s8 = sadd.s32 1, %s1280_s26 }
   0x7   : > { %s28_s9 = ssub.s32 %s1284_s27, %s1359_s30  ;;  %p38_p0 = scmp.ne.s32.totalorder %s1280_s26, %s1276_s25 }
   0x8   : > { %p29_p1 = scmp.eq.s32.totalorder %s28_s9, 0  ;;  %p39_p2 = scmp.eq.s32.totalorder %s1284_s27, 0 }
   0x9   : > { %p44_p3 = scmp.ne.s32.totalorder %s1276_s25, %s1272_s24  ;;  %p45_p4 = scmp.eq.s32.totalorder %s1355_s28, 0 }
   0xa   : > { %s1371_s10 = scalar_select %p29_p1, %s1280_s26, %s31_s8  }
   0xb   : > { %p1373_p5 = por %p39_p2, %p38_p0  ;;  %p1377_p6 = por %p45_p4, %p44_p3 }
   0xc   : > { %p178_p7 = scmp.eq.s32.totalorder %s1355_s28, 3  ;;  %p184_p8 = scmp.eq.s32.totalorder %s970_s29, 3 }
   0xd   : > { %s1700_s12 = scalar_select %p1377_p6, 1, 0 }
   0xe   : > { %p1085_p9 = scmp.lt.s32.totalorder %s1284_s27, 4  ;;  %p1383_p10 = por %p178_p7, %p38_p0 }
   0xf   : > { %p1387_p11 = por %p184_p8, %p44_p3  ;;  %s242_s15 = sand.u32 1, %s1280_s26  }
  0x10   : > { %s1701_s13 = scalar_select %p1383_p10, 1, 0 }
  0x11   : > { %s1702_s14 = scalar_select %p1387_p11, 1, 0 }
  0x12   : > { %s1022_s16 = sshll.u32 %s1284_s27, 11  ;;  %s973_s17 = sshll.u32 %s242_s15, 7 }
  0x13   : > { %s1396_s20 = scalar_lea.hbm %s1689_s0, %s1022_s16  ;;  %s246_s21 = scalar_lea.vmem [#allocation2], %s973_s17 }
  0x14   : > { %s254_s22 = sshll.u32 %s246_s21, 4  ;;  %p1400_p12 = pnand %p1085_p9, %p1373_p5  ;;  %s1404_s22 = int_to_ptr.vmem [resolvable:$true] %s254_s22 }
  0x15   : > { %s1406_s29 = scalar_lea.sflag [#allocation3], %s242_s15  ;;  %s1192_s8 = scalar_lea.hbm %s1396_s20, 2048 }
  0x16   : > { %p1193_p13 = scmp.ne.s32.totalorder %s1396_s20, %s1192_s8  ;;  %p1194_p0 = pneg %p1400_p12 }
  0x17   : > { %s1197_s17 = scalar_lea.hbm %s1689_s0, 8192  ;;  %p1198_p3 = scmp.lt.s32.totalorder %s1396_s20, %s1689_s0 }
  0x18   : > { %p1195_p1 = pnand %p1194_p0, %p1193_p13  ;;  %p1199_p4 = scmp.lt.s32.totalorder %s1197_s17, %s1192_s8 }
  0x1a   : > { %p1196_p2 = pneg %p1195_p1  ;;  %p1200_p5 = por %p1199_p4, %p1198_p3 }
  0x1c   : > { %p1201_p7 = pnand %p1200_p5, %p1196_p2 }
  0x1e   : > { %1204 = shalt.err (!%p1201_p7)
}
  0x1f   : > { %s1205_s15 = scalar_lea.vmem %s1404_s22, 2048  ;;  %s1286_s19 = smov [#allocation2]  }
  0x20   : > { %p1206_p8 = scmp.ne.s32.totalorder %s1404_s22, %s1205_s15  ;;  %s1210_s21 = sshll.u32 %s1286_s19, 4  ;;  %s1211_s21 = int_to_ptr.vmem [resolvable:$false] %s1210_s21 }
  0x21   : > { %s1212_s9 = scalar_lea.vmem %s1211_s21, 4096  ;;  %p1213_p1 = scmp.lt.s32.totalorder %s1404_s22, %s1211_s21 }
  0x22   : > { %p1208_p9 = pnand %p1206_p8, %p1194_p0  ;;  %p1214_p11 = scmp.lt.s32.totalorder %s1212_s9, %s1205_s15 }
  0x24   : > { %p1209_p13 = pneg %p1208_p9  ;;  %p1215_p10 = por %p1214_p11, %p1213_p1 }
  0x26   : > { %p1216_p6 = pnand %p1215_p10, %p1209_p13 }
  0x28   : > { %1219 = shalt.err (!%p1216_p6)
}
  0x29   : > { %s1287_s8 = smov 256   ;;  %s1288_s16 = smov 16  }
  0x2a   : > { %1080 = dma.hbm_to_vmem [thread:$0]  (!%p1400_p12), %s1396_s20, 2048, %s1404_s22, %s1406_s29, %s1287_s8, %s1287_s8, %s1288_s16  }
  0x2b   : > { %p977_p0 = scmp.ge.s32.totalorder %s1284_s27, 1  ;;  %p271_p2 = scmp.lt.s32.totalorder %s1284_s27, 5 }
  0x2d   : > { %p272_p3 = pnand %p977_p0, %p271_p2 }
  0x2e   : > { %s1430_s17 = sand.u32 (!%p272_p3), 1, %s1276_s25   ;;  %p1704_p6 = scmp.ne.s32.totalorder (!%p272_p3), %s1700_s12, 0 }
  0x2f   : > { %275 = sbr.rel (%p272_p3) target bundleno = 683 (0x2ab), region = 44  ;;  %s978_s11 = sshll.u32 (!%p272_p3), %s1430_s17, 7 }
  0x30   : > { %s278_s18 = scalar_lea.sflag (!%p272_p3), [#allocation3], %s1430_s17  ;;  %s1434_s15 = scalar_lea.vmem (!%p272_p3), [#allocation2], %s978_s11 }
  0x34   : > { %1263 = dma.done.wait (%p1704_p6), %s278_s18, 2048  }
  0x35   : > { %1265 = vsyncadd (%p1704_p6), %s278_s18, 4294965248  ;;  %v1125_v0 = vld [vmem:[%s1691_s2 + $0x78] sm:$0xff]   ;;  %v1127_v2 = vld [vmem:[%s1691_s2 + $0x70] sm:$0xff]   ;;  %s980_s12 = sshll.u32 %s1355_s28, 3  ;;  %vm561_vm0 = vcmask 261120   ;;  %s1290_s9 = smov 112  }
  0x36   : > { %v1126_v1 = vld [vmem:[%s1691_s2 + $0x38] sm:$0xff]   ;;  %1033 = vmatprep.subr.bf16.mxu0 %v1125_v0  ;;  %v1128_v3 = vld [vmem:[%s1691_s2 + $0x30] sm:$0xff]   ;;  %v1129_v4 = vld [vmem:[%s1691_s2 + $0x68] sm:$0xff]   ;;  %p324_p10 = scmp.lt.s32.totalorder %s980_s12, 31  ;;  %vm678_vm1 = vcmask 130048   ;;  %s979_s20 = sshll.u32 %s1430_s17, 6 }
  0x37   : > { %1034 = vmatpush3.bf16.msra.mxu0 %v1126_v1  ;;  %v1130_v5 = vld [vmem:[%s1691_s2 + $0x28] sm:$0xff]   ;;  %v1131_v6 = vld [vmem:[%s1691_s2 + $0x60] sm:$0xff]   ;;  %v1133_v8 = vld [vmem:[%s1691_s2 + $0x58] sm:$0xff]   ;;  %p1705_p12 = scmp.ne.s32.totalorder %s1701_s13, 0 }
  0x38   : > { %1035 = vmatprep.subr.bf16.mxu0 %v1127_v2  ;;  %v1132_v7 = vld [vmem:[%s1691_s2 + $0x20] sm:$0xff]   ;;  %v1134_v9 = vld [vmem:[%s1691_s2 + $0x18] sm:$0xff]   ;;  %v1135_v10 = vld [vmem:[%s1691_s2 + $0x50] sm:$0xff]   ;;  %s1712_s12 = smov (!%p324_p10, %s980_s12), 31 }
  0x39   : > { %v338_v11 = vld [vmem:[%s1434_s15 + $0x8] sm:$0xff]  ;;  %v340_v12 = vld [vmem:[%s1434_s15 + $0x18] sm:$0xff]  ;;  %v1136_v14 = vld [vmem:[%s1691_s2 + $0x10] sm:$0xff]   ;;  %s981_s16 = sshll.u32 %s1712_s12, 3 }
  0x3a   : > { %v354_v13 = vpack.c.bf16 %v340_v12, %v338_v11  ;;  %v1137_v15 = vld [vmem:[%s1691_s2 + $0x48] sm:$0xff]   ;;  %v1139_v17 = vld [vmem:[%s1691_s2 + $0x40] sm:$0xff]   ;;  %v339_v20 = vld [vmem:[%s1434_s15 + $0x10] sm:$0xff]  ;;  %s1518_s22 = scalar_lea.vmem %s1696_s7, %s981_s16  ;;  %s1592_s18 = scalar_lea.vmem %s1690_s1, %s981_s16 }
  0x3b   : > { %1036 = vmatpush3.bf16.msra.mxu0 %v1128_v3  ;;  %v1138_v16 = vld [vmem:[%s1691_s2 + $0x8] sm:$0xff]   ;;  %v1140_v18 = vld [vmem:[%s1691_s2] sm:$0xff]   ;;  %v344_v22 = vld [vmem:[%s1434_s15 + $0x38] sm:$0xff] }
  0x3c   : > { %1037 = vmatprep.subr.bf16.mxu0 %v1129_v4  ;;  %528 = vmatprep.mubr.bf16.mxu0 %v354_v13  ;;  %v337_v19 = vld [vmem:[%s1434_s15] sm:$0xff]  ;;  %v342_v21 = vld [vmem:[%s1434_s15 + $0x28] sm:$0xff]  ;;  %v343_v26 = vld [vmem:[%s1434_s15 + $0x30] sm:$0xff] }
  0x3d   : > { %v353_v23 = vpack.c.bf16 %v339_v20, %v337_v19  ;;  %v356_v24 = vpack.c.bf16 %v344_v22, %v342_v21  ;;  %v341_v25 = vld [vmem:[%s1434_s15 + $0x20] sm:$0xff]  ;;  %v346_v27 = vld [vmem:[%s1434_s15 + $0x48] sm:$0xff]  ;;  %v348_v28 = vld [vmem:[%s1434_s15 + $0x58] sm:$0xff] }
  0x3e   : > { %v355_v29 = vpack.c.bf16 %v343_v26, %v341_v25  ;;  %v358_v30 = vpack.c.bf16 %v348_v28, %v346_v27  ;;  %v345_v31 = vld [vmem:[%s1434_s15 + $0x40] sm:$0xff]  ;;  %v347_v32 = vld [vmem:[%s1434_s15 + $0x50] sm:$0xff]  ;;  %v350_v33 = vld [vmem:[%s1434_s15 + $0x68] sm:$0xff] }
  0x3f   : > { %1038 = vmatpush3.bf16.msra.mxu0 %v1130_v5  ;;  %v352_v34 = vld [vmem:[%s1434_s15 + $0x78] sm:$0xff]  ;;  %v357_v35 = vpack.c.bf16 %v347_v32, %v345_v31  ;;  %v349_v37 = vld [vmem:[%s1434_s15 + $0x60] sm:$0xff]  ;;  %v351_v38 = vld [vmem:[%s1434_s15 + $0x70] sm:$0xff]  ;;  %s1627_s15 = scalar_lea.vmem [#allocation5], %s979_s20 }
  0x40   : > { %1039 = vmatprep.subr.bf16.mxu0 %v1131_v6  ;;  %v360_v36 = vpack.c.bf16 %v352_v34, %v350_v33  ;;  %v359_v39 = vpack.c.bf16 %v351_v38, %v349_v37  ;;  %v1511_v41 = vld [vmem:[%s1692_s3] ss:$0 sm:$0xff]  ;;  %v1141_v62 = vld [vmem:[%s1693_s4 + $0x4] ss:$8 sps:$4 sm:$0xff]   ;;  %s856_s23 = sshll.u32 %s1627_s15, 4  ;;  %s1646_s23 = int_to_ptr.vmem [resolvable:$true] %s856_s23 }
  0x41   : > { %v1143_v1 = vld [vmem:[%s1693_s4] ss:$8 sps:$4 sm:$0xff]   ;;  %705 = vmatprep.subr.bf16.mxu1 %v1141_v62  ;;  %s1220_s8 = scalar_lea.vmem %s1646_s23, 1024 }
  0x42   : > { %706 = vmatpush1.bf16.msra.mxu1 %v1143_v1  ;;  %v571_v38 = vld [vmem:[%s1592_s18 + $0x8] sm:$0xff]  ;;  %p1221_p11 = scmp.ne.s32.totalorder %s1646_s23, %s1220_s8 }
  0x43   : > { %1040 = vmatpush3.bf16.msra.mxu0 %v1132_v7 }
  0x44   : > { %1041 = vmatprep.subr.bf16.mxu0 %v1133_v8  ;;  %v1289_v8 = vmov 0   ;;  %p1222_p4 = pnand %p1221_p11, %p1705_p12 }
  0x45   : > { %723 = vmatprep.mubr.bf16.mxu1 %v1289_v8 }
  0x46   : > { %p1223_p5 = pneg %p1222_p4 }
  0x47   : > { %1042 = vmatpush3.bf16.msra.mxu0 %v1134_v9 }
  0x48   : > { %1043 = vmatprep.subr.bf16.mxu0 %v1135_v10 }
  0x4b   : > { %1044 = vmatpush3.bf16.msra.mxu0 %v1136_v14 }
  0x4c   : > { %1045 = vmatprep.subr.bf16.mxu0 %v1137_v15 }
  0x4f   : > { %1046 = vmatpush3.bf16.msra.mxu0 %v1138_v16 }
  0x50   : > { %1047 = vmatprep.subr.bf16.mxu0 %v1139_v17 }
  0x53   : > { %1048 = vmatpush3.bf16.msra.mxu0 %v1140_v18 }
  0x56   : > { %529 = vmatmul.mubr.bf16.vlgmr.msra.gmra.mxu0 %v353_v23 }
  0x57   : > { %536 = vmatprep.mubr.bf16.mxu0 %v356_v24 }
  0x5e   : > { %537 = vmatmul.mubr.bf16.gmra.mxu0 %v355_v29 }
  0x5f   : > { %544 = vmatprep.mubr.bf16.mxu0 %v358_v30 }
  0x66   : > { %545 = vmatmul.mubr.bf16.gmra.mxu0 %v357_v35 }
  0x67   : > { %552 = vmatprep.mubr.bf16.mxu0 %v360_v36  ;;  %v570_v36 = vld [vmem:[%s1592_s18] sm:$0xff] }
  0x6e   : > { %553 = vmatmul.mubr.bf16.gmra.mxu0 %v359_v39 }
 0x116   : > { %v1049_v40 = vpop.f32.mrf.mxu0 }
 0x118   : > { %v1050_v42 = vpop.f32.mrf.mxu0 }
 0x119   : > { %v1051_v43 = vadd.f32 %v1050_v42, %v1049_v40 }
 0x11a   : > { %v1052_v44 = vpop.f32.mrf.mxu0 }
 0x11b   : > { %v1521_v45 = vadd.f32 %v1051_v43, %v1511_v41 }
 0x11c   : > { %v1053_v46 = vpop.f32.mrf.mxu0 }
 0x11d   : > { %562 = vst.msk [vmem:[%s1518_s22] sm:$0xff] %vm561_vm0, %v1521_v45  ;;  %v578_v47 = vmul.f32 0.5, %v1521_v45  ;;  %v1054_v48 = vadd.f32 %v1053_v46, %v1052_v44  ;;  %v572_v44 = vld [vmem:[%s1592_s18 + $0x10] sm:$0xff] }
 0x11e   : > { %v1055_v49 = vpop.f32.mrf.mxu0 }
 0x11f   : > { %v586_v50 = vmul.f32 1.442695, %v578_v47  ;;  %v1528_v51 = vadd.f32 %v1054_v48, %v1511_v41  ;;  %v573_v48 = vld [vmem:[%s1592_s18 + $0x18] sm:$0xff] }
 0x120   : > { %v1056_v52 = vpop.f32.mrf.mxu0 }
 0x121   : > { %1144 = vpow2.f32 %v586_v50  ;;  %563 = vst.msk [vmem:[%s1518_s22 + $0x8] sm:$0xff] %vm561_vm0, %v1528_v51  ;;  %v579_v53 = vmul.f32 0.5, %v1528_v51  ;;  %v1057_v54 = vadd.f32 %v1056_v52, %v1055_v49 }
 0x122   : > { %v1058_v55 = vpop.f32.mrf.mxu0 }
 0x123   : > { %v588_v56 = vmul.f32 1.442695, %v579_v53  ;;  %v1535_v57 = vadd.f32 %v1057_v54, %v1511_v41 }
 0x124   : > { %v1059_v58 = vpop.f32.mrf.mxu0 }
 0x125   : > { %1146 = vpow2.f32 %v588_v56  ;;  %564 = vst.msk [vmem:[%s1518_s22 + $0x10] sm:$0xff] %vm561_vm0, %v1535_v57  ;;  %v580_v59 = vmul.f32 0.5, %v1535_v57  ;;  %v1060_v60 = vadd.f32 %v1059_v58, %v1058_v55  ;;  %v575_v56 = vld [vmem:[%s1592_s18 + $0x28] sm:$0xff] }
 0x126   : > { %v1061_v61 = vpop.f32.mrf.mxu0 }
 0x127   : > { %v590_v63 = vmul.f32 1.442695, %v580_v59  ;;  %v1545_v0 = vadd.f32 %v1060_v60, %v1511_v41 }
 0x128   : > { %v1062_v2 = vpop.f32.mrf.mxu0 }
 0x129   : > { %1148 = vpow2.f32 %v590_v63  ;;  %565 = vst.msk [vmem:[%s1518_s22 + $0x18] sm:$0xff] %vm561_vm0, %v1545_v0  ;;  %v581_v3 = vmul.f32 0.5, %v1545_v0  ;;  %v1063_v4 = vadd.f32 %v1062_v2, %v1061_v61  ;;  %v576_v63 = vld [vmem:[%s1592_s18 + $0x30] sm:$0xff]  ;;  %v577_v2 = vld [vmem:[%s1592_s18 + $0x38] sm:$0xff] }
 0x12a   : > { %v1064_v5 = vpop.f32.mrf.mxu0 }
 0x12b   : > { %v592_v6 = vmul.f32 1.442695, %v581_v3  ;;  %v1555_v7 = vadd.f32 %v1063_v4, %v1511_v41 }
 0x12c   : > { %v1065_v9 = vpop.f32.mrf.mxu0 }
 0x12d   : > { %1150 = vpow2.f32 %v592_v6  ;;  %566 = vst.msk [vmem:[%s1518_s22 + $0x20] sm:$0xff] %vm561_vm0, %v1555_v7  ;;  %v582_v10 = vmul.f32 0.5, %v1555_v7  ;;  %v1066_v11 = vadd.f32 %v1065_v9, %v1064_v5 }
 0x12e   : > { %v1145_v12 = vpop.eup %1144  ;;  %v1067_v13 = vpop.f32.mrf.mxu0 }
 0x12f   : > { %v594_v14 = vmul.f32 1.442695, %v582_v10  ;;  %v1563_v15 = vadd.f32 %v1066_v11, %v1511_v41  ;;  %610 = vrot.lane.b32.xlu0 %v1145_v12, %s1290_s9  ;;  %v656_v12 = vld [vmem:[%s1694_s5] sm:$0x3] }
 0x130   : > { %v1068_v16 = vpop.f32.mrf.mxu0 }
 0x131   : > { %1152 = vpow2.f32 %v594_v14  ;;  %567 = vst.msk [vmem:[%s1518_s22 + $0x28] sm:$0xff] %vm561_vm0, %v1563_v15  ;;  %v583_v17 = vmul.f32 0.5, %v1563_v15  ;;  %v1069_v18 = vadd.f32 %v1068_v16, %v1067_v13 }
 0x132   : > { %v1147_v19 = vpop.eup %1146  ;;  %v1070_v20 = vpop.f32.mrf.mxu0 }
 0x133   : > { %v596_v21 = vmul.f32 1.442695, %v583_v17  ;;  %v1571_v22 = vadd.f32 %v1069_v18, %v1511_v41  ;;  %612 = vrot.lane.b32.xlu0 %v1147_v19, %s1290_s9 }
 0x134   : > { %v1071_v23 = vpop.f32.mrf.mxu0 }
 0x135   : > { %1154 = vpow2.f32 %v596_v21  ;;  %568 = vst.msk [vmem:[%s1518_s22 + $0x30] sm:$0xff] %vm561_vm0, %v1571_v22  ;;  %v584_v24 = vmul.f32 0.5, %v1571_v22  ;;  %v1072_v25 = vadd.f32 %v1071_v23, %v1070_v20 }
 0x136   : > { %v1149_v26 = vpop.eup %1148 }
 0x137   : > { %v598_v27 = vmul.f32 1.442695, %v584_v24  ;;  %v558_v28 = vadd.f32 %v1072_v25, %v1511_v41  ;;  %614 = vrot.lane.b32.xlu1 %v1149_v26, %s1290_s9 }
 0x139   : > { %1156 = vpow2.f32 %v598_v27  ;;  %569 = vst.msk [vmem:[%s1518_s22 + $0x38] sm:$0xff] %vm561_vm0, %v558_v28  ;;  %v585_v29 = vmul.f32 0.5, %v558_v28  ;;  %s1032_s22 = sshll.u32 %s1355_s28, 10  ;;  %s1291_s28 = smov [#allocation5]  }
 0x13a   : > { %v1151_v30 = vpop.eup %1150  ;;  %s1644_s21 = scalar_lea.hbm %s1695_s6, %s1032_s22  ;;  %s1224_s11 = sshll.u32 %s1291_s28, 4  ;;  %s1225_s11 = int_to_ptr.vmem [resolvable:$false] %s1224_s11 }
 0x13b   : > { %v600_v31 = vmul.f32 1.442695, %v585_v29  ;;  %616 = vrot.lane.b32.xlu1 %v1151_v30, %s1290_s9  ;;  %p1227_p7 = scmp.lt.s32.totalorder %s1646_s23, %s1225_s11 }
 0x13d   : > { %1158 = vpow2.f32 %v600_v31 }
 0x13e   : > { %v1153_v32 = vpop.eup %1152 }
 0x13f   : > { %618 = vrot.lane.b32.xlu0 %v1153_v32, %s1290_s9 }
 0x142   : > { %v1155_v33 = vpop.eup %1154 }
 0x143   : > { %620 = vrot.lane.b32.xlu1 %v1155_v33, %s1290_s9 }
 0x146   : > { %v1157_v34 = vpop.eup %1156 }
 0x147   : > { %622 = vrot.lane.b32.xlu0 %v1157_v34, %s1290_s9 }
 0x14a   : > { %v1159_v35 = vpop.eup %1158 }
 0x14b   : > { %624 = vrot.lane.b32.xlu1 %v1159_v35, %s1290_s9  ;;  %s837_s9 = scalar_lea.sflag [#allocation4], %s1430_s17 }
 0x1a1   : > { %v611_v37 = vpop.permute.xlu0 %610 }
 0x1a2   : > { %v634_v39 = vmul.f32 %v611_v37, %v570_v36 }
 0x1a4   : > { %v642_v42 = vadd.f32 %v634_v39, %v1521_v45 }
 0x1a5   : > { %v613_v40 = vpop.permute.xlu0 %612 }
 0x1a6   : > { %v635_v41 = vmul.f32 %v613_v40, %v571_v38 }
 0x1a8   : > { %v643_v43 = vadd.f32 %v635_v41, %v1528_v51  ;;  %v574_v51 = vld [vmem:[%s1592_s18 + $0x20] sm:$0xff]  ;;  %s1226_s18 = scalar_lea.vmem %s1225_s11, 2048 }
 0x1a9   : > { %v615_v46 = vpop.permute.xlu1 %614  ;;  %p1228_p8 = scmp.lt.s32.totalorder %s1226_s18, %s1220_s8 }
 0x1aa   : > { %v650_v47 = vpack.c.bf16 %v643_v43, %v642_v42  ;;  %v636_v49 = vmul.f32 %v615_v46, %v572_v44 }
 0x1ab   : > { %p1229_p9 = por %p1228_p8, %p1227_p7 }
 0x1ac   : > { %1003 = vmatmul.mubr.msk.bf16.vlgmr.msra.gmra.mxu1 %vm678_vm1, %v650_v47  ;;  %v644_v53 = vadd.f32 %v636_v49, %v1535_v57 }
 0x1ad   : > { %v617_v50 = vpop.permute.xlu1 %616  ;;  %733 = vmatprep.mubr.bf16.mxu1 %v1289_v8  ;;  %p1230_p13 = pnand %p1229_p9, %p1223_p5 }
 0x1ae   : > { %v637_v52 = vmul.f32 %v617_v50, %v573_v48 }
 0x1b0   : > { %v645_v45 = vadd.f32 %v637_v52, %v1545_v0 }
 0x1b1   : > { %v619_v54 = vpop.permute.xlu0 %618 }
 0x1b2   : > { %v651_v55 = vpack.c.bf16 %v645_v45, %v644_v53  ;;  %v638_v58 = vmul.f32 %v619_v54, %v574_v51 }
 0x1b4   : > { %1004 = vmatmul.mubr.msk.bf16.gmra.mxu1 %vm678_vm1, %v651_v55  ;;  %v646_v61 = vadd.f32 %v638_v58, %v1555_v7  ;;  %v658_v7 = vlaneseq }
 0x1b5   : > { %v621_v59 = vpop.permute.xlu1 %620  ;;  %743 = vmatprep.mubr.bf16.mxu1 %v1289_v8 }
 0x1b6   : > { %v639_v60 = vmul.f32 %v621_v59, %v575_v56  ;;  %v659_v10 = vshrl.u32 %v658_v7, 7 }
 0x1b8   : > { %v647_v62 = vadd.f32 %v639_v60, %v1563_v15  ;;  %v660_v11 = vsub.s32 0, %v659_v10  ;;  %v664_v13 = vsub.s32 1, %v659_v10 }
 0x1b9   : > { %v623_v57 = vpop.permute.xlu0 %622 }
 0x1ba   : > { %v652_v1 = vpack.c.bf16 %v647_v62, %v646_v61  ;;  %v640_v0 = vmul.f32 %v623_v57, %v576_v63  ;;  %v661_v14 = vrot.slane %v656_v12, %v660_v11  ;;  %v1619_v15 = vrot.slane %v656_v12, %v664_v13 }
 0x1bc   : > { %1005 = vmatmul.mubr.msk.bf16.gmra.mxu1 %vm678_vm1, %v652_v1  ;;  %v648_v5 = vadd.f32 %v640_v0, %v1571_v22 }
 0x1bd   : > { %v625_v3 = vpop.permute.xlu1 %624  ;;  %753 = vmatprep.mubr.bf16.mxu1 %v1289_v8 }
 0x1be   : > { %v641_v4 = vmul.f32 %v625_v3, %v577_v2 }
 0x1c0   : > { %v649_v6 = vadd.f32 %v641_v4, %v558_v28 }
 0x1c2   : > { %v653_v9 = vpack.c.bf16 %v649_v6, %v648_v5 }
 0x1c4   : > { %1006 = vmatmul.mubr.msk.bf16.gmra.mxu1 %vm678_vm1, %v653_v9 }
 0x26c   : > { %v725_v16 = vpop.f32.mrf.mxu1 }
 0x26d   : > { %v726_v8 = vadd.f32 %v725_v16, %v661_v14 }
 0x26e   : > { %v727_v17 = vpop.f32.mrf.mxu1 }
 0x26f   : > { %v728_v18 = vadd.f32 %v727_v17, %v1619_v15  ;;  %1160 = vtanh.f32 %v726_v8 }
 0x270   : > { %v729_v19 = vpop.f32.mrf.mxu1 }
 0x271   : > { %1162 = vtanh.f32 %v728_v18  ;;  %v730_v20 = vadd.f32 %v729_v19, %v661_v14 }
 0x272   : > { %v731_v21 = vpop.f32.mrf.mxu1 }
 0x273   : > { %v732_v22 = vadd.f32 %v731_v21, %v1619_v15  ;;  %1164 = vtanh.f32 %v730_v20 }
 0x274   : > { %v735_v23 = vpop.f32.mrf.mxu1 }
 0x275   : > { %1166 = vtanh.f32 %v732_v22  ;;  %v736_v24 = vadd.f32 %v735_v23, %v661_v14 }
 0x276   : > { %v737_v25 = vpop.f32.mrf.mxu1 }
 0x277   : > { %v738_v26 = vadd.f32 %v737_v25, %v1619_v15  ;;  %1168 = vtanh.f32 %v736_v24 }
 0x278   : > { %v739_v27 = vpop.f32.mrf.mxu1 }
 0x279   : > { %1170 = vtanh.f32 %v738_v26  ;;  %v740_v28 = vadd.f32 %v739_v27, %v661_v14 }
 0x27a   : > { %v741_v29 = vpop.f32.mrf.mxu1 }
 0x27b   : > { %v742_v30 = vadd.f32 %v741_v29, %v1619_v15  ;;  %1172 = vtanh.f32 %v740_v28 }
 0x27c   : > { %v745_v31 = vpop.f32.mrf.mxu1  ;;  %v1161_v32 = vpop.eup %1160 }
 0x27d   : > { %1174 = vtanh.f32 %v742_v30  ;;  %v746_v33 = vadd.f32 %v745_v31, %v661_v14 }
 0x27e   : > { %v1163_v34 = vpop.eup %1162  ;;  %v747_v35 = vpop.f32.mrf.mxu1 }
 0x27f   : > { %v1023_v36 = vpack.c.bf16 %v1163_v34, %v1161_v32  ;;  %v748_v37 = vadd.f32 %v747_v35, %v1619_v15  ;;  %1176 = vtanh.f32 %v746_v33 }
 0x280   : > { %v749_v38 = vpop.f32.mrf.mxu1  ;;  %v1165_v39 = vpop.eup %1164 }
 0x281   : > { %828 = vst [vmem:[%s1627_s15] sm:$0xff] %v1023_v36  ;;  %1178 = vtanh.f32 %v748_v37  ;;  %v750_v40 = vadd.f32 %v749_v38, %v661_v14 }
 0x282   : > { %v1167_v41 = vpop.eup %1166  ;;  %v751_v42 = vpop.f32.mrf.mxu1 }
 0x283   : > { %v1024_v43 = vpack.c.bf16 %v1167_v41, %v1165_v39  ;;  %v752_v44 = vadd.f32 %v751_v42, %v1619_v15  ;;  %1180 = vtanh.f32 %v750_v40 }
 0x284   : > { %v755_v46 = vpop.f32.mrf.mxu1  ;;  %v1169_v47 = vpop.eup %1168 }
 0x285   : > { %829 = vst [vmem:[%s1627_s15 + $0x8] sm:$0xff] %v1024_v43  ;;  %1182 = vtanh.f32 %v752_v44  ;;  %v756_v48 = vadd.f32 %v755_v46, %v661_v14 }
 0x286   : > { %v1171_v49 = vpop.eup %1170  ;;  %v757_v50 = vpop.f32.mrf.mxu1 }
 0x287   : > { %v1025_v52 = vpack.c.bf16 %v1171_v49, %v1169_v47  ;;  %v758_v53 = vadd.f32 %v757_v50, %v1619_v15  ;;  %1184 = vtanh.f32 %v756_v48 }
 0x288   : > { %v759_v45 = vpop.f32.mrf.mxu1  ;;  %v1173_v51 = vpop.eup %1172 }
 0x289   : > { %830 = vst [vmem:[%s1627_s15 + $0x10] sm:$0xff] %v1025_v52  ;;  %1186 = vtanh.f32 %v758_v53  ;;  %v760_v54 = vadd.f32 %v759_v45, %v661_v14 }
 0x28a   : > { %v1175_v55 = vpop.eup %1174  ;;  %v761_v56 = vpop.f32.mrf.mxu1 }
 0x28b   : > { %v1026_v58 = vpack.c.bf16 %v1175_v55, %v1173_v51  ;;  %v762_v59 = vadd.f32 %v761_v56, %v1619_v15  ;;  %1188 = vtanh.f32 %v760_v54 }
 0x28c   : > { %v1177_v60 = vpop.eup %1176 }
 0x28d   : > { %831 = vst [vmem:[%s1627_s15 + $0x18] sm:$0xff] %v1026_v58  ;;  %1190 = vtanh.f32 %v762_v59 }
 0x28e   : > { %v1179_v61 = vpop.eup %1178 }
 0x28f   : > { %v1027_v62 = vpack.c.bf16 %v1179_v61, %v1177_v60 }
 0x290   : > { %v1181_v63 = vpop.eup %1180 }
 0x291   : > { %832 = vst [vmem:[%s1627_s15 + $0x20] sm:$0xff] %v1027_v62 }
 0x292   : > { %v1183_v57 = vpop.eup %1182 }
 0x293   : > { %v1028_v1 = vpack.c.bf16 %v1183_v57, %v1181_v63 }
 0x294   : > { %v1185_v2 = vpop.eup %1184 }
 0x295   : > { %833 = vst [vmem:[%s1627_s15 + $0x28] sm:$0xff] %v1028_v1 }
 0x296   : > { %v1187_v0 = vpop.eup %1186 }
 0x297   : > { %v1029_v3 = vpack.c.bf16 %v1187_v0, %v1185_v2 }
 0x298   : > { %v1189_v4 = vpop.eup %1188 }
 0x299   : > { %834 = vst [vmem:[%s1627_s15 + $0x30] sm:$0xff] %v1029_v3 }
 0x29a   : > { %v1191_v5 = vpop.eup %1190 }
 0x29b   : > { %v1030_v6 = vpack.c.bf16 %v1191_v5, %v1189_v4 }
 0x29d   : > { %835 = vst [vmem:[%s1627_s15 + $0x38] sm:$0xff] %v1030_v6 }
 0x29e   : > { %1233 = shalt.err (!%p1230_p13)
}
 0x29f   : > { %s1234_s12 = scalar_lea.hbm %s1644_s21, 1024  ;;  %s1238_s15 = scalar_lea.hbm %s1695_s6, 4096 }
 0x2a0   : > { %p1235_p1 = scmp.ne.s32.totalorder %s1644_s21, %s1234_s12  ;;  %p1239_p3 = scmp.lt.s32.totalorder %s1644_s21, %s1695_s6 }
 0x2a1   : > { %p1240_p6 = scmp.lt.s32.totalorder %s1238_s15, %s1234_s12 }
 0x2a2   : > { %p1236_p0 = pnand %p1235_p1, %p1705_p12 }
 0x2a3   : > { %p1241_p10 = por %p1240_p6, %p1239_p3 }
 0x2a4   : > { %p1237_p2 = pneg %p1236_p0 }
 0x2a6   : > { %p1242_p11 = pnand %p1241_p10, %p1237_p2 }
 0x2a8   : > { %1245 = shalt.err (!%p1242_p11)
}
 0x2a9   : > { %s1292_s19 = smov 128   ;;  %s1293_s8 = smov 8  }
 0x2aa   : > { %1075 = dma.vmem_to_hbm [thread:$0]  (%p1705_p12), %s1646_s23, 1024, %s1644_s21, %s837_s9, %s1292_s19, %s1292_s19, %s1293_s8  }
 0x2ab PF: > { %p1086_p4 = scmp.ge.s32.totalorder %s1284_s27, 2  ;;  %s875_s28 = sand.u32 1, %s1272_s24  }
 0x2ac   : > { %p1706_p5 = scmp.ne.s32.totalorder %s1702_s14, 0  ;;  %s876_s11 = scalar_lea.sflag [#allocation4], %s875_s28 }
 0x2ae   : > { %p1082_p7 = pnand %p1086_p4, %p1706_p5 }
 0x2b0   : > { %p1083_p8 = pneg %p1082_p7 }
 0x2b2   : > { %1267 = dma.done.wait (%p1083_p8), %s876_s11, 1024  }
 0x2b3   : > { %1269 = vsyncadd (%p1083_p8), %s876_s11, 4294966272  ;;  %p21_p9 = scmp.ge.s32.totalorder %s1359_s30, 6   ;;  %s1707_s24 = smov %s1276_s25 }
 0x2b4   : > { %s1708_s25 = smov %s1280_s26  ;;  %s1709_s26 = smov %s1371_s10 }
 0x2b5   : > { %s1710_s27 = smov %s1359_s30  ;;  %23 = sbr.rel (!%p21_p9) target bundleno = 5 (0x5), region = 104 }
 0x2ba   :  { %889 = vsyncpa [#allocation3], 1 }
 0x2bb   :  { %891 = vsyncpa [#allocation3 + $0x1], 1 }
 0x2bc   :  { %892 = vsyncpa [#allocation4], 1 }
 0x2bd   :  { %894 = vsyncpa [#allocation4 + $0x1], 1 }

</bundles_post_ra>
